<compile_context>
chip_gen: v6e
topology: v6e:2x2x1
jax: 0.10.0
libtpu: 0.0.40
codegen_flags: <defaults>
</compile_context>

<pallas_src>
import functools

import jax
import jax.numpy as jnp
from jax.experimental import pallas as pl
from jax.experimental.pallas import tpu as pltpu


def _round_up(v, m):
    return ((v + m - 1) // m) * m


def _vmem_bytes_estimate(bt, nt):
    """Per-step VMEM estimate, including 128-lane padding of the thin input block."""
    lane, fp = 128, 4
    inp = 2 * bt * nt * lane * fp      # (bt, nt, Din<=3) input block, lane-padded, 2 buffers
    act = 4 * bt * nt * lane * fp      # a few live (bt*nt, H) activations through the MLP
    other = 4 * bt * lane * fp + (1 << 20)   # accumulator, output block, weights, slack
    return inp + act + other


def _latent_encoder_kernel(d_ref, w_in_ref, b_in_ref, w_mlp_ref, b_mlp_ref,
                           w_head_ref, b_head_ref, out_ref, acc_ref,
                           *, num_layers, hidden_dim, latent_dim, in_dim,
                           n_points, batch_tile, point_tile, needs_mask):
    j = pl.program_id(1)                                  # point-chunk index (reduction axis)

    d = d_ref[...]                                        # (bt, nt, Din)

    # ---- input layer: K = Din (<= 3) -> VPU broadcasted FMAs, no wasted MXU pass ----
    si = d[:, :, 0:1] * w_in_ref[0:1, :] + b_in_ref[...]  # (bt, nt, H)
    for k in range(1, in_dim):
        si = si + d[:, :, k:k + 1] * w_in_ref[k:k + 1, :]

    # ---- per-point MLP on flattened rows (reshape is layout-preserving: nt % 8 == 0) ----
    rows = batch_tile * point_tile
    si = si.reshape(rows, hidden_dim)
    for l in range(num_layers):
        si = jnp.dot(si, w_mlp_ref[l], preferred_element_type=jnp.float32) + b_mlp_ref[l]
        si = jnp.maximum(si, 0.0)

    # ---- partial sum over the points axis: sublane split + XLU reduce ----
    si = si.reshape(batch_tile, point_tile, hidden_dim)
    if needs_mask:
        # Zero out padded point rows (bias/relu would otherwise contaminate the mean).
        pid = j * point_tile + jax.lax.broadcasted_iota(jnp.int32, (point_tile, 1), 0)
        si = jnp.where(pid < n_points, si, 0.0)
    psum = jnp.sum(si, axis=1)                            # (bt, H)

    @pl.when(j == 0)
    def _():
        acc_ref[...] = jnp.zeros_like(acc_ref)

    acc_ref[...] += psum

    # ---- heads (fused, lane-dense 2*latent output) on the last point chunk ----
    @pl.when(j == pl.num_programs(1) - 1)
    def _():
        sc = acc_ref[...] * (1.0 / n_points)              # mean over the true N points
        head = jnp.dot(sc, w_head_ref[...],
                       preferred_element_type=jnp.float32) + b_head_ref[...]  # (bt, 2L)
        col = jax.lax.broadcasted_iota(jnp.int32, head.shape, 1)
        sig = 0.1 + 0.9 / (1.0 + jnp.exp(-head))          # 0.1 + 0.9*sigmoid (EUP)
        out_ref[...] = jnp.where(col < latent_dim, head, sig).astype(out_ref.dtype)


def latent_encoder(x, y, params, *, num_layers=3, hidden_dim=32, latent_dim=32,
                   batch_tile=None, point_tile=512):
    """x: (B, N, Dx), y: (B, N, Dy) -> (mean, sigma), each (B, latent_dim)."""
    B, N, Dx = x.shape
    _, _, Dy = y.shape
    in_dim = Dx + Dy

    # One packed input stream: halves input DMA descriptors / lane-padded VMEM buffers.
    d = jnp.concatenate([x, y], axis=-1).astype(jnp.float32)          # (B, N, Din)

    # Fused head weights: one (H, 2*latent) matmul instead of two 32-lane-wide ones.
    w_head = jnp.concatenate([params["w_mu"], params["w_lv"]], axis=1)   # (H, 2L)
    b_head = jnp.concatenate([params["b_mu"], params["b_lv"]], axis=1)   # (1, 2L)

    # ---- tile selection -------------------------------------------------------------
    # Batch tile: default bt = B (one batch step; "parallel" buys nothing on single-TC
    # v5e/v6e and extra steps only add ~0.35us each).  Pass batch_tile on v7x so that
    # grid[0] >= 4 and both TensorCores get pipelined work.
    bt = B if batch_tile is None else min(batch_tile, B)
    assert B % bt == 0, "batch_tile must divide the batch size"
    assert bt == B or bt % 8 == 0, "batch_tile must be a multiple of 8 (or equal B)"

    # Point tile: multiple of 8 (f32 sublane) so the in-kernel reshapes are
    # layout-preserving; shrink until the padding-aware per-step estimate fits a
    # conservative budget (works on v5e 16 MiB default scoped / v7x 64 MiB physical).
    nt = _round_up(min(point_tile, _round_up(N, 8)), 8)
    budget = 24 << 20
    while nt > 8 and _vmem_bytes_estimate(bt, nt) > budget:
        nt = _round_up(nt // 2, 8)

    n_pad = _round_up(N, nt)
    if n_pad != N:
        d = jnp.pad(d, ((0, 0), (0, n_pad - N), (0, 0)))
    needs_mask = n_pad != N

    grid = (B // bt, n_pad // nt)
    vmem_limit = int(min(48 << 20,
                         max(32 << 20, _vmem_bytes_estimate(bt, nt) + (8 << 20))))

    kernel = functools.partial(
        _latent_encoder_kernel,
        num_layers=num_layers, hidden_dim=hidden_dim, latent_dim=latent_dim,
        in_dim=in_dim, n_points=N, batch_tile=bt, point_tile=nt,
        needs_mask=needs_mask)

    def _full(a):
        nd = a.ndim
        return pl.BlockSpec(a.shape, lambda i, j, _nd=nd: (0,) * _nd)

    packed = pl.pallas_call(
        kernel,
        out_shape=jax.ShapeDtypeStruct((B, 2 * latent_dim), jnp.float32),
        grid_spec=pltpu.PrefetchScalarGridSpec(
            num_scalar_prefetch=0,
            grid=grid,
            in_specs=[
                pl.BlockSpec((bt, nt, in_dim), lambda i, j: (i, j, 0)),  # packed x|y
                _full(params["w_in"]), _full(params["b_in"]),
                _full(params["w_mlp"]), _full(params["b_mlp"]),
                _full(w_head), _full(b_head),
            ],
            out_specs=pl.BlockSpec((bt, 2 * latent_dim), lambda i, j: (i, 0)),
            scratch_shapes=[pltpu.VMEM((bt, hidden_dim), jnp.float32)],  # pooled-sum acc
        ),
        compiler_params=pltpu.CompilerParams(
            dimension_semantics=("parallel", "arbitrary"),
            vmem_limit_bytes=vmem_limit),
    )(d, params["w_in"], params["b_in"], params["w_mlp"], params["b_mlp"],
      w_head, b_head)

    mean = packed[:, :latent_dim]
    sigma = packed[:, latent_dim:]
    return mean, sigma


def init_params(key, in_dim, hidden_dim, latent_dim, num_layers):
    """Deterministic synthetic parameters (not a checkpoint load)."""
    ks = jax.random.split(key, 8)
    s = 0.1
    return {
        "w_in":  s * jax.random.normal(ks[0], (in_dim, hidden_dim), jnp.float32),
        "b_in":  s * jax.random.normal(ks[1], (1, hidden_dim), jnp.float32),
        "w_mlp": s * jax.random.normal(ks[2], (num_layers, hidden_dim, hidden_dim), jnp.float32),
        "b_mlp": s * jax.random.normal(ks[3], (num_layers, 1, hidden_dim), jnp.float32),
        "w_mu":  s * jax.random.normal(ks[4], (hidden_dim, latent_dim), jnp.float32),
        "b_mu":  s * jax.random.normal(ks[5], (1, latent_dim), jnp.float32),
        "w_lv":  s * jax.random.normal(ks[6], (hidden_dim, latent_dim), jnp.float32),
        "b_lv":  s * jax.random.normal(ks[7], (1, latent_dim), jnp.float32),
    }


def _reference(x, y, params, num_layers):
    """Pure-JAX reference matching the PyTorch LatentEncoder.forward."""
    d = jnp.concatenate([x, y], axis=-1)
    si = d @ params["w_in"] + params["b_in"][0]
    for l in range(num_layers):
        si = jax.nn.relu(si @ params["w_mlp"][l] + params["b_mlp"][l, 0])
    sc = si.mean(axis=1)
    mean = sc @ params["w_mu"] + params["b_mu"][0]
    log_sigma = sc @ params["w_lv"] + params["b_lv"][0]
    sigma = 0.1 + 0.9 * jax.nn.sigmoid(log_sigma)
    return mean, sigma


if __name__ == "__main__":
    B, N = 32, 8                                   # batch, num points
    x_dim, y_dim = 2, 1
    hidden_dim, latent_dim, num_layers = 32, 32, 3

    key = jax.random.PRNGKey(0)
    kx, ky, kp = jax.random.split(key, 3)
    x = jax.random.normal(kx, (B, N, x_dim), jnp.float32)
    y = jax.random.normal(ky, (B, N, y_dim), jnp.float32)
    params = init_params(kp, x_dim + y_dim, hidden_dim, latent_dim, num_layers)

    # batch_tile=8 -> grid = (4, 1): >= 4 parallel batch steps (keeps both v7x TCs busy
    # with pipeline depth); on single-TC chips the 3 extra steps cost ~1us, negligible.
    mean, sigma = latent_encoder(x, y, params, num_layers=num_layers,
                                 hidden_dim=hidden_dim, latent_dim=latent_dim,
                                 batch_tile=8)
    mean, sigma = jax.block_until_ready((mean, sigma))

    ref_mean, ref_sigma = _reference(x, y, params, num_layers)
    assert mean.shape == (B, latent_dim) and sigma.shape == (B, latent_dim)
    assert jnp.allclose(mean, ref_mean, atol=1e-5, rtol=1e-5), "mean mismatch vs reference"
    assert jnp.allclose(sigma, ref_sigma, atol=1e-5, rtol=1e-5), "sigma mismatch vs reference"

    # TODO(synk): torch.distributions.Normal has no Pallas equivalent; we return the
    # (mean, sigma) parameter arrays instead of a distribution object.
    print("KERNEL_OK")
</pallas_src>

<mosaic_0001>
module attributes {stable_mosaic.version = 11 : i64} {
  func.func @_latent_encoder_kernel(%arg0: i32, %arg1: i32, %arg2: memref<8x8x3xf32, #tpu.memory_space<vmem>>, %arg3: memref<3x32xf32, #tpu.memory_space<vmem>>, %arg4: memref<1x32xf32, #tpu.memory_space<vmem>>, %arg5: memref<3x32x32xf32, #tpu.memory_space<vmem>>, %arg6: memref<3x1x32xf32, #tpu.memory_space<vmem>>, %arg7: memref<32x64xf32, #tpu.memory_space<vmem>>, %arg8: memref<1x64xf32, #tpu.memory_space<vmem>>, %arg9: memref<8x64xf32, #tpu.memory_space<vmem>>, %arg10: memref<8x32xf32, #tpu.memory_space<vmem>>) attributes {dimension_semantics = [#tpu.dimension_semantics<parallel>, #tpu.dimension_semantics<arbitrary>], iteration_bounds = array<i64: 4, 1>, scalar_prefetch = 0 : i64, scratch_operands = 1 : i64, tpu.core_type = #tpu.core_type<tc>, window_params = [{transform_indices = @transform_0, window_bounds = array<i64: 8, 8, 3>}, {pipeline_mode = #tpu.pipeline_mode<synchronous>, transform_indices = @transform_1, window_bounds = array<i64: 3, 32>}, {pipeline_mode = #tpu.pipeline_mode<synchronous>, transform_indices = @transform_2, window_bounds = array<i64: 1, 32>}, {pipeline_mode = #tpu.pipeline_mode<synchronous>, transform_indices = @transform_3, window_bounds = array<i64: 3, 32, 32>}, {pipeline_mode = #tpu.pipeline_mode<synchronous>, transform_indices = @transform_4, window_bounds = array<i64: 3, 1, 32>}, {pipeline_mode = #tpu.pipeline_mode<synchronous>, transform_indices = @transform_5, window_bounds = array<i64: 32, 64>}, {pipeline_mode = #tpu.pipeline_mode<synchronous>, transform_indices = @transform_6, window_bounds = array<i64: 1, 64>}, {transform_indices = @transform_7, window_bounds = array<i64: 8, 64>}]} {
    %c0 = arith.constant 0 : index
    %c0_0 = arith.constant 0 : index
    %c0_1 = arith.constant 0 : index
    %0 = vector.load %arg2[%c0, %c0_0, %c0_1] : memref<8x8x3xf32, #tpu.memory_space<vmem>>, vector<8x8x3xf32>
    %1 = vector.extract_strided_slice %0 {offsets = [0, 0, 0], sizes = [8, 8, 1], strides = [1, 1, 1]} : vector<8x8x3xf32> to vector<8x8x1xf32>
    %c0_2 = arith.constant 0 : index
    %c0_3 = arith.constant 0 : index
    %2 = vector.load %arg3[%c0_2, %c0_3] : memref<3x32xf32, #tpu.memory_space<vmem>>, vector<1x32xf32>
    %3 = vector.shape_cast %2 : vector<1x32xf32> to vector<1x1x32xf32>
    %4 = vector.broadcast %1 : vector<8x8x1xf32> to vector<8x8x32xf32>
    %5 = vector.broadcast %3 : vector<1x1x32xf32> to vector<8x8x32xf32>
    %6 = arith.mulf %4, %5 : vector<8x8x32xf32>
    %c0_4 = arith.constant 0 : index
    %c0_5 = arith.constant 0 : index
    %7 = vector.load %arg4[%c0_4, %c0_5] : memref<1x32xf32, #tpu.memory_space<vmem>>, vector<1x32xf32>
    %8 = vector.shape_cast %7 : vector<1x32xf32> to vector<1x1x32xf32>
    %9 = vector.broadcast %8 : vector<1x1x32xf32> to vector<8x8x32xf32>
    %10 = arith.addf %6, %9 : vector<8x8x32xf32>
    %11 = vector.extract_strided_slice %0 {offsets = [0, 0, 1], sizes = [8, 8, 1], strides = [1, 1, 1]} : vector<8x8x3xf32> to vector<8x8x1xf32>
    %c1 = arith.constant 1 : index
    %c0_6 = arith.constant 0 : index
    %12 = vector.load %arg3[%c1, %c0_6] : memref<3x32xf32, #tpu.memory_space<vmem>>, vector<1x32xf32>
    %13 = vector.shape_cast %12 : vector<1x32xf32> to vector<1x1x32xf32>
    %14 = vector.broadcast %11 : vector<8x8x1xf32> to vector<8x8x32xf32>
    %15 = vector.broadcast %13 : vector<1x1x32xf32> to vector<8x8x32xf32>
    %16 = arith.mulf %14, %15 : vector<8x8x32xf32>
    %17 = arith.addf %10, %16 : vector<8x8x32xf32>
    %18 = vector.extract_strided_slice %0 {offsets = [0, 0, 2], sizes = [8, 8, 1], strides = [1, 1, 1]} : vector<8x8x3xf32> to vector<8x8x1xf32>
    %c2 = arith.constant 2 : index
    %c0_7 = arith.constant 0 : index
    %19 = vector.load %arg3[%c2, %c0_7] : memref<3x32xf32, #tpu.memory_space<vmem>>, vector<1x32xf32>
    %20 = vector.shape_cast %19 : vector<1x32xf32> to vector<1x1x32xf32>
    %21 = vector.broadcast %18 : vector<8x8x1xf32> to vector<8x8x32xf32>
    %22 = vector.broadcast %20 : vector<1x1x32xf32> to vector<8x8x32xf32>
    %23 = arith.mulf %21, %22 : vector<8x8x32xf32>
    %24 = arith.addf %17, %23 : vector<8x8x32xf32>
    %25 = vector.shape_cast %24 : vector<8x8x32xf32> to vector<64x32xf32>
    %c0_8 = arith.constant 0 : index
    %c0_9 = arith.constant 0 : index
    %c0_10 = arith.constant 0 : index
    %26 = vector.load %arg5[%c0_8, %c0_9, %c0_10] : memref<3x32x32xf32, #tpu.memory_space<vmem>>, vector<1x32x32xf32>
    %27 = vector.shape_cast %26 : vector<1x32x32xf32> to vector<32x32xf32>
    %cst = arith.constant dense<0.000000e+00> : vector<64x32xf32>
    %28 = tpu.matmul %25, %27, %cst {dimension_numbers = #tpu.dot_dimension_numbers<[1], [0], [0], [1], [0, 0, 1, 1], [], []>} : vector<64x32xf32>, vector<32x32xf32>, vector<64x32xf32> -> vector<64x32xf32>
    %c0_11 = arith.constant 0 : index
    %c0_12 = arith.constant 0 : index
    %c0_13 = arith.constant 0 : index
    %29 = vector.load %arg6[%c0_11, %c0_12, %c0_13] : memref<3x1x32xf32, #tpu.memory_space<vmem>>, vector<1x1x32xf32>
    %30 = vector.shape_cast %29 : vector<1x1x32xf32> to vector<1x32xf32>
    %31 = vector.broadcast %30 : vector<1x32xf32> to vector<64x32xf32>
    %32 = arith.addf %28, %31 : vector<64x32xf32>
    %cst_14 = arith.constant 0.000000e+00 : f32
    %33 = vector.broadcast %cst_14 : f32 to vector<64x32xf32>
    %34 = arith.maximumf %32, %33 : vector<64x32xf32>
    %c1_15 = arith.constant 1 : index
    %c0_16 = arith.constant 0 : index
    %c0_17 = arith.constant 0 : index
    %35 = vector.load %arg5[%c1_15, %c0_16, %c0_17] : memref<3x32x32xf32, #tpu.memory_space<vmem>>, vector<1x32x32xf32>
    %36 = vector.shape_cast %35 : vector<1x32x32xf32> to vector<32x32xf32>
    %cst_18 = arith.constant dense<0.000000e+00> : vector<64x32xf32>
    %37 = tpu.matmul %34, %36, %cst_18 {dimension_numbers = #tpu.dot_dimension_numbers<[1], [0], [0], [1], [0, 0, 1, 1], [], []>} : vector<64x32xf32>, vector<32x32xf32>, vector<64x32xf32> -> vector<64x32xf32>
    %c1_19 = arith.constant 1 : index
    %c0_20 = arith.constant 0 : index
    %c0_21 = arith.constant 0 : index
    %38 = vector.load %arg6[%c1_19, %c0_20, %c0_21] : memref<3x1x32xf32, #tpu.memory_space<vmem>>, vector<1x1x32xf32>
    %39 = vector.shape_cast %38 : vector<1x1x32xf32> to vector<1x32xf32>
    %40 = vector.broadcast %39 : vector<1x32xf32> to vector<64x32xf32>
    %41 = arith.addf %37, %40 : vector<64x32xf32>
    %cst_22 = arith.constant 0.000000e+00 : f32
    %42 = vector.broadcast %cst_22 : f32 to vector<64x32xf32>
    %43 = arith.maximumf %41, %42 : vector<64x32xf32>
    %c2_23 = arith.constant 2 : index
    %c0_24 = arith.constant 0 : index
    %c0_25 = arith.constant 0 : index
    %44 = vector.load %arg5[%c2_23, %c0_24, %c0_25] : memref<3x32x32xf32, #tpu.memory_space<vmem>>, vector<1x32x32xf32>
    %45 = vector.shape_cast %44 : vector<1x32x32xf32> to vector<32x32xf32>
    %cst_26 = arith.constant dense<0.000000e+00> : vector<64x32xf32>
    %46 = tpu.matmul %43, %45, %cst_26 {dimension_numbers = #tpu.dot_dimension_numbers<[1], [0], [0], [1], [0, 0, 1, 1], [], []>} : vector<64x32xf32>, vector<32x32xf32>, vector<64x32xf32> -> vector<64x32xf32>
    %c2_27 = arith.constant 2 : index
    %c0_28 = arith.constant 0 : index
    %c0_29 = arith.constant 0 : index
    %47 = vector.load %arg6[%c2_27, %c0_28, %c0_29] : memref<3x1x32xf32, #tpu.memory_space<vmem>>, vector<1x1x32xf32>
    %48 = vector.shape_cast %47 : vector<1x1x32xf32> to vector<1x32xf32>
    %49 = vector.broadcast %48 : vector<1x32xf32> to vector<64x32xf32>
    %50 = arith.addf %46, %49 : vector<64x32xf32>
    %cst_30 = arith.constant 0.000000e+00 : f32
    %51 = vector.broadcast %cst_30 : f32 to vector<64x32xf32>
    %52 = arith.maximumf %50, %51 : vector<64x32xf32>
    %53 = vector.shape_cast %52 : vector<64x32xf32> to vector<8x8x32xf32>
    %cst_31 = arith.constant dense<0.000000e+00> : vector<8x32xf32>
    %54 = vector.multi_reduction <add>, %53, %cst_31 [1] : vector<8x8x32xf32> to vector<8x32xf32>
    %c0_i32 = arith.constant 0 : i32
    %55 = arith.cmpi eq, %arg1, %c0_i32 : i32
    %56 = arith.extui %55 : i1 to i32
    %c0_i32_32 = arith.constant 0 : i32
    %57 = arith.cmpi ne, %56, %c0_i32_32 : i32
    scf.if %57 {
      %cst_39 = arith.constant 0.000000e+00 : f32
      %64 = vector.broadcast %cst_39 : f32 to vector<8x32xf32>
      %c0_40 = arith.constant 0 : index
      %c0_41 = arith.constant 0 : index
      %65 = vector.load %arg10[%c0_40, %c0_41] : memref<8x32xf32, #tpu.memory_space<vmem>>, vector<8x32xf32>
      tpu.vector_store %arg10[%c0_40, %c0_41], %64 {strides = array<i32>} : memref<8x32xf32, #tpu.memory_space<vmem>>, vector<8x32xf32>,
    } else {
    }
    %c0_33 = arith.constant 0 : index
    %c0_34 = arith.constant 0 : index
    %58 = vector.load %arg10[%c0_33, %c0_34] : memref<8x32xf32, #tpu.memory_space<vmem>>, vector<8x32xf32>
    %59 = arith.addf %58, %54 : vector<8x32xf32>
    %c0_35 = arith.constant 0 : index
    %c0_36 = arith.constant 0 : index
    %60 = vector.load %arg10[%c0_35, %c0_36] : memref<8x32xf32, #tpu.memory_space<vmem>>, vector<8x32xf32>
    tpu.vector_store %arg10[%c0_35, %c0_36], %59 {strides = array<i32>} : memref<8x32xf32, #tpu.memory_space<vmem>>, vector<8x32xf32>,
    %c0_i32_37 = arith.constant 0 : i32
    %61 = arith.cmpi eq, %arg1, %c0_i32_37 : i32
    %62 = arith.extui %61 : i1 to i32
    %c0_i32_38 = arith.constant 0 : i32
    %63 = arith.cmpi ne, %62, %c0_i32_38 : i32
    scf.if %63 {
      %c0_39 = arith.constant 0 : index
      %c0_40 = arith.constant 0 : index
      %64 = vector.load %arg10[%c0_39, %c0_40] : memref<8x32xf32, #tpu.memory_space<vmem>>, vector<8x32xf32>
      %cst_41 = arith.constant 1.250000e-01 : f32
      %65 = vector.broadcast %cst_41 : f32 to vector<8x32xf32>
      %66 = arith.mulf %64, %65 : vector<8x32xf32>
      %c0_42 = arith.constant 0 : index
      %c0_43 = arith.constant 0 : index
      %67 = vector.load %arg7[%c0_42, %c0_43] : memref<32x64xf32, #tpu.memory_space<vmem>>, vector<32x64xf32>
      %cst_44 = arith.constant dense<0.000000e+00> : vector<8x64xf32>
      %68 = tpu.matmul %66, %67, %cst_44 {dimension_numbers = #tpu.dot_dimension_numbers<[1], [0], [0], [1], [0, 0, 1, 1], [], []>} : vector<8x32xf32>, vector<32x64xf32>, vector<8x64xf32> -> vector<8x64xf32>
      %c0_45 = arith.constant 0 : index
      %c0_46 = arith.constant 0 : index
      %69 = vector.load %arg8[%c0_45, %c0_46] : memref<1x64xf32, #tpu.memory_space<vmem>>, vector<1x64xf32>
      %70 = vector.broadcast %69 : vector<1x64xf32> to vector<8x64xf32>
      %71 = arith.addf %68, %70 : vector<8x64xf32>
      %72 = tpu.iota {dimensions = array<i32: 1>} : vector<8x64xi32>
      %cst_47 = arith.constant 0.000000e+00 : f32
      %73 = vector.broadcast %cst_47 : f32 to vector<8x64xf32>
      %74 = arith.subf %73, %71 : vector<8x64xf32>
      %75 = math.exp %74 : vector<8x64xf32>
      %cst_48 = arith.constant 1.000000e+00 : f32
      %76 = vector.broadcast %cst_48 : f32 to vector<8x64xf32>
      %77 = arith.addf %76, %75 : vector<8x64xf32>
      %cst_49 = arith.constant 0.899999976 : f32
      %78 = vector.broadcast %cst_49 : f32 to vector<8x64xf32>
      %79 = arith.divf %78, %77 : vector<8x64xf32>
      %cst_50 = arith.constant 1.000000e-01 : f32
      %80 = vector.broadcast %cst_50 : f32 to vector<8x64xf32>
      %81 = arith.addf %80, %79 : vector<8x64xf32>
      %c32_i32 = arith.constant 32 : i32
      %82 = vector.broadcast %c32_i32 : i32 to vector<8x64xi32>
      %83 = arith.cmpi slt, %72, %82 : vector<8x64xi32>
      %84 = arith.select %83, %71, %81 : vector<8x64xi1>, vector<8x64xf32>
      %c0_51 = arith.constant 0 : index
      %c0_52 = arith.constant 0 : index
      %85 = vector.load %arg9[%c0_51, %c0_52] : memref<8x64xf32, #tpu.memory_space<vmem>>, vector<8x64xf32>
      tpu.vector_store %arg9[%c0_51, %c0_52], %84 {strides = array<i32>} : memref<8x64xf32, #tpu.memory_space<vmem>>, vector<8x64xf32>,
    } else {
    }
    return
  }
  func.func @transform_0(%arg0: i32, %arg1: i32) -> (i32, i32, i32) {
    %c0_i32 = arith.constant 0 : i32
    %c0_i32_0 = arith.constant 0 : i32
    return %arg0, %arg1, %c0_i32 : i32, i32, i32
  }
  func.func @transform_1(%arg0: i32, %arg1: i32) -> (i32, i32) {
    %c0_i32 = arith.constant 0 : i32
    %c0_i32_0 = arith.constant 0 : i32
    %c0_i32_1 = arith.constant 0 : i32
    return %c0_i32, %c0_i32_0 : i32, i32
  }
  func.func @transform_2(%arg0: i32, %arg1: i32) -> (i32, i32) {
    %c0_i32 = arith.constant 0 : i32
    %c0_i32_0 = arith.constant 0 : i32
    %c0_i32_1 = arith.constant 0 : i32
    return %c0_i32, %c0_i32_0 : i32, i32
  }
  func.func @transform_3(%arg0: i32, %arg1: i32) -> (i32, i32, i32) {
    %c0_i32 = arith.constant 0 : i32
    %c0_i32_0 = arith.constant 0 : i32
    %c0_i32_1 = arith.constant 0 : i32
    %c0_i32_2 = arith.constant 0 : i32
    return %c0_i32, %c0_i32_0, %c0_i32_1 : i32, i32, i32
  }
  func.func @transform_4(%arg0: i32, %arg1: i32) -> (i32, i32, i32) {
    %c0_i32 = arith.constant 0 : i32
    %c0_i32_0 = arith.constant 0 : i32
    %c0_i32_1 = arith.constant 0 : i32
    %c0_i32_2 = arith.constant 0 : i32
    return %c0_i32, %c0_i32_0, %c0_i32_1 : i32, i32, i32
  }
  func.func @transform_5(%arg0: i32, %arg1: i32) -> (i32, i32) {
    %c0_i32 = arith.constant 0 : i32
    %c0_i32_0 = arith.constant 0 : i32
    %c0_i32_1 = arith.constant 0 : i32
    return %c0_i32, %c0_i32_0 : i32, i32
  }
  func.func @transform_6(%arg0: i32, %arg1: i32) -> (i32, i32) {
    %c0_i32 = arith.constant 0 : i32
    %c0_i32_0 = arith.constant 0 : i32
    %c0_i32_1 = arith.constant 0 : i32
    return %c0_i32, %c0_i32_0 : i32, i32
  }
  func.func @transform_7(%arg0: i32, %arg1: i32) -> (i32, i32) {
    %c0_i32 = arith.constant 0 : i32
    %c0_i32_0 = arith.constant 0 : i32
    return %arg0, %c0_i32 : i32, i32
  }
}

</mosaic_0001>

<bundles_post_ra>
// kernel: tpu_custom_call.1
= control target key start
LH: loop header
LB: loop body
LE: loop exit
PB: predicated region body
PF: predicated region fallthrough
CT: control target
= control target key end

     0   :  { %12 = vsyncpa [#allocation4], 0  ;;  %s1849_s0 = inlined_call_operand.vmem [shape: f32[32,8,3], index: 0, kind: input, shape index: {}]   ;;  %s1850_s1 = inlined_call_operand.vmem [shape: f32[3,32], index: 1, kind: input, shape index: {}]   ;;  %s1851_s2 = inlined_call_operand.vmem [shape: f32[1,32], index: 2, kind: input, shape index: {}]   ;;  %s1852_s3 = inlined_call_operand.vmem [shape: f32[3,32,32], index: 3, kind: input, shape index: {}]   ;;  %s1853_s4 = inlined_call_operand.vmem [shape: f32[3,1,32], index: 4, kind: input, shape index: {}]   ;;  %s1854_s5 = inlined_call_operand.vmem [shape: f32[32,64], index: 5, kind: input, shape index: {}]   ;;  %s1855_s6 = inlined_call_operand.vmem [shape: f32[1,64], index: 6, kind: input, shape index: {}]   ;;  %s1856_s7 = inlined_call_operand.hbm [shape: f32[32,64], index: 7, kind: output, shape index: {}]  }
   0x1   :  { %14 = vsyncpa [#allocation4 + $0x1], 0  ;;  %s1583_s24 = smov 0   ;;  %s1585_s25 = smov 0  }
   0x2   :  { %s1587_s26 = smov 0   ;;  %s1589_s27 = smov 0  }
   0x3   :  { %s1591_s28 = smov 0   ;;  %s1593_s29 = smov 0  }
   0x4 LB: > { %s1206_s30 = sadd.s32 4294967295, %s1535_s29   ;;  %s1207_s8 = sadd.s32 4294967294, %s1535_s29   ;;  %s1535_s29 = sphi %s1593_s29, %s20_s29   ;;  %s1531_s28 = sphi %s1591_s28, %s1863_s28   ;;  %s1527_s27 = sphi %s1589_s27, %s1862_s27   ;;  %s1523_s26 = sphi %s1587_s26, %s1861_s26   ;;  %s1519_s25 = sphi %s1585_s25, %s1860_s25   ;;  %s1515_s24 = sphi %s1583_s24, %s1859_s24  }
   0x5   : > { %s32_s9 = sadd.s32 1, %s1531_s28  ;;  %s193_s10 = sadd.s32 1, %s1523_s26 }
   0x6   : > { %p34_p0 = scmp.ge.s32.totalorder %s32_s9, 4  ;;  %p203_p1 = scmp.ne.s32.totalorder %s1523_s26, %s1519_s25 }
   0x7   : > { %p204_p2 = scmp.eq.s32.totalorder %s1206_s30, 3  ;;  %p209_p3 = scmp.ne.s32.totalorder %s1519_s25, %s1515_s24 }
   0x8   : > { %s1865_s9 = smov (%p34_p0, %s32_s9), 0  ;;  %p210_p5 = scmp.eq.s32.totalorder %s1207_s8, 3 }
   0x9   : > { %p1623_p4 = por %p204_p2, %p203_p1  ;;  %s190_s12 = ssub.s32 %s1531_s28, %s1865_s9 }
   0xa   : > { %p1210_p6 = scmp.ge.s32.totalorder %s1535_s29, 1  ;;  %p191_p7 = scmp.eq.s32.totalorder %s190_s12, 0 }
   0xb   : > { %p1630_p8 = por %p210_p5, %p209_p3  ;;  %p258_p9 = scmp.lt.s32.totalorder %s1535_s29, 5 }
   0xc   : > { %s1636_s14 = scalar_select %p191_p7, %s1523_s26, %s193_s10  }
   0xd   : > { %p259_p10 = pnand %p1210_p6, %p258_p9 }
   0xe   : > { %s1212_s15 = sshll.u32 (!%p259_p10), %s1527_s27, 3  ;;  %s1258_s18 = sshll.u32 (!%p259_p10), %s1527_s27, 7 }
   0xf   : > { %262 = sbr.rel (%p259_p10) target bundleno = 1087 (0x43f), region = 48  ;;  %p294_p11 = scmp.lt.s32.totalorder (!%p259_p10), %s1212_s15, 31 }
  0x10   : > { %s1809_s23 = scalar_lea.hbm (!%p259_p10), %s1856_s7, %s1258_s18  ;;  %s1542_s27 = smov (!%p259_p10), [#allocation3]  }
  0x11   : > { %s1463_s10 = sshll.u32 (!%p259_p10), %s1542_s27, 4  ;;  %s1464_s10 = int_to_ptr.vmem [resolvable:$false] %s1463_s10 }
  0x12   : > { %s1465_s12 = scalar_lea.vmem (!%p259_p10), %s1464_s10, 256 }
  0x14   : > { %v1537_v0 = vmov 1   ;;  %v1538_v1 = vmov 0   ;;  %s1867_s15 = smov (!%p294_p11, %s1212_s15), 31  ;;  %v487_v4 = vld [vmem:[%s1852_s3 + $0x18] sm:$0xff]  ;;  %v486_v6 = vld [vmem:[%s1852_s3 + $0x10] sm:$0xff]  ;;  %v1539_v7 = vmov 2  }
  0x15   : > { %1442 = vset.pattern.permute.xlu1 %v1537_v0  ;;  %1441 = vset.pattern.permute.xlu0 %v1538_v1  ;;  %s1213_s16 = sshll.u32 %s1867_s15, 3  ;;  %v485_v8 = vld [vmem:[%s1852_s3 + $0x8] sm:$0xff]  ;;  %v484_v10 = vld [vmem:[%s1852_s3] sm:$0xff]  ;;  %vm495_vm0 = vcmask 261120   ;;  %vm1541_vm1 = vmmov 0   ;;  %vm1003_vm2 = vcmask 1041409  }
  0x16   : > { %s1643_s19 = scalar_lea.vmem %s1849_s0, %s1213_s16  ;;  %1302 = vmatprep.subr.mxu0 %v487_v4  ;;  %1373 = vmatprep.subr.mxu1 %v487_v4  ;;  %v1672_v15 = vld [vmem:[%s1850_s1] ss:$0 sm:$0xff]  ;;  %v1683_v22 = vld [vmem:[%s1850_s1 + $0x1] ss:$0 sm:$0xff]  ;;  %v1690_v25 = vld [vmem:[%s1850_s1 + $0x2] ss:$0 sm:$0xff] }
  0x17   : > { %v302_v2 = vld [vmem:[%s1643_s19] sm:$0xff]  ;;  %v303_v3 = vld [vmem:[%s1643_s19 + $0x8] sm:$0xff]  ;;  %v304_v5 = vld [vmem:[%s1643_s19 + $0x10] sm:$0xff]  ;;  %1303 = vmatpush3.msra.mxu0 %v487_v4  ;;  %1377 = vmatpush3.msra.mxu1 %v487_v4  ;;  %vm1005_vm3 = vcmask 1042434   ;;  %vm1007_vm4 = vcmask 1043459   ;;  %vm1009_vm5 = vcmask 1044484  }
  0x18   : > { %380 = vperm.xlu1 %1442, %v302_v2   ;;  %313 = vperm.xlu0 %1441, %v302_v2   ;;  %v305_v9 = vld [vmem:[%s1643_s19 + $0x18] sm:$0xff]  ;;  %v306_v11 = vld [vmem:[%s1643_s19 + $0x20] sm:$0xff]  ;;  %v307_v12 = vld [vmem:[%s1643_s19 + $0x28] sm:$0xff]  ;;  %vm1011_vm6 = vcmask 1045509   ;;  %vm1013_vm7 = vcmask 1046534   ;;  %vm1015_vm8 = vcmask 1047559  }
  0x19   : > { %1304 = vmatprep.subr.mxu0 %v486_v6  ;;  %1374 = vmatprep.subr.mxu1 %v486_v6  ;;  %v308_v13 = vld [vmem:[%s1643_s19 + $0x30] sm:$0xff]  ;;  %v309_v14 = vld [vmem:[%s1643_s19 + $0x38] sm:$0xff]  ;;  %v1678_v19 = vld [vmem:[%s1851_s2] ss:$0 sm:$0xff]  ;;  %s290_s16 = sand.u32 1, %s1519_s25   ;;  %vm1120_vm10 = vcmask 523264  }
  0x1a   : > { %1305 = vmatpush3.msra.mxu0 %v486_v6  ;;  %1378 = vmatpush3.msra.mxu1 %v486_v6  ;;  %s1211_s17 = sshll.u32 %s290_s16, 3  ;;  %s1123_s30 = scalar_lea.sflag [#allocation4], %s290_s16 }
  0x1b   : > { %1306 = vmatprep.subr.mxu0 %v485_v8  ;;  %1375 = vmatprep.subr.mxu1 %v485_v8  ;;  %s292_s19 = scalar_lea.vmem [#allocation3], %s1211_s17 }
  0x1c   : > { %384 = vperm.xlu1 %1442, %v303_v3   ;;  %318 = vperm.xlu0 %1441, %v303_v3   ;;  %s1136_s20 = sshll.u32 %s292_s19, 4  ;;  %s1137_s20 = int_to_ptr.vmem [resolvable:$true] %s1136_s20 }
  0x1d   : > { %1307 = vmatpush3.msra.mxu0 %v485_v8  ;;  %1379 = vmatpush3.msra.mxu1 %v485_v8  ;;  %s1459_s8 = scalar_lea.vmem %s1137_s20, 128  ;;  %p1466_p1 = scmp.lt.s32.totalorder %s1137_s20, %s1464_s10 }
  0x1e   : > { %1308 = vmatprep.subr.mxu0 %v484_v10  ;;  %1376 = vmatprep.subr.mxu1 %v484_v10  ;;  %p1460_p12 = scmp.ne.s32.totalorder %s1137_s20, %s1459_s8  ;;  %p1467_p2 = scmp.lt.s32.totalorder %s1465_s12, %s1459_s8 }
  0x1f   : > { %1309 = vmatpush3.msra.mxu0 %v484_v10  ;;  %1380 = vmatpush3.msra.mxu1 %v484_v10 }
  0x20   : > { %1443 = vset.pattern.permute.xlu1 %v1539_v7  ;;  %323 = vperm.xlu0 %1441, %v304_v5   ;;  %p1461_p13 = pnand %p1460_p12, %p1623_p4  ;;  %p1468_p3 = por %p1467_p2, %p1466_p1 }
  0x21   : > { %433 = vperm.xlu1 %1443, %v302_v2  }
  0x22   : > { %p1462_p0 = pneg %p1461_p13 }
  0x24   : > { %328 = vperm.xlu0 %1441, %v305_v9   ;;  %p1469_p5 = pnand %p1468_p3, %p1462_p0 }
  0x25   : > { %437 = vperm.xlu1 %1443, %v303_v3  }
  0x28   : > { %1446 = vset.pattern.permute.xlu0 %v1539_v7 }
  0x29   : > { %1444 = vset.pattern.permute.xlu1 %v1537_v0  ;;  %441 = vperm.xlu0 %1446, %v304_v5  }
  0x2a   : > { %392 = vperm.xlu1 %1444, %v305_v9  }
  0x2d   : > { %449 = vperm.xlu0 %1446, %v306_v11  }
  0x2e   : > { %1445 = vset.pattern.permute.xlu1 %v1538_v1 }
  0x2f   : > { %333 = vperm.xlu1 %1445, %v306_v11  }
  0x31   : > { %1450 = vset.pattern.permute.xlu0 %v1537_v0 }
  0x32   : > { %388 = vperm.xlu0 %1450, %v304_v5  }
  0x33   : > { %338 = vperm.xlu1 %1445, %v307_v12  }
  0x36   : > { %396 = vperm.xlu0 %1450, %v306_v11  }
  0x37   : > { %1447 = vset.pattern.permute.xlu1 %v1539_v7 }
  0x38   : > { %445 = vperm.xlu1 %1447, %v305_v9  }
  0x3a   : > { %404 = vperm.xlu0 %1450, %v308_v13  }
  0x3c   : > { %1448 = vset.pattern.permute.xlu1 %v1537_v0 }
  0x3d   : > { %400 = vperm.xlu1 %1448, %v307_v12  }
  0x3e   : > { %1454 = vset.pattern.permute.xlu0 %v1539_v7 }
  0x3f   : > { %461 = vperm.xlu0 %1454, %v309_v14  }
  0x41   : > { %1449 = vset.pattern.permute.xlu1 %v1538_v1 }
  0x42   : > { %343 = vperm.xlu1 %1449, %v308_v13  }
  0x46   : > { %348 = vperm.xlu1 %1449, %v309_v14  }
  0x4a   : > { %1451 = vset.pattern.permute.xlu1 %v1539_v7 }
  0x4b   : > { %453 = vperm.xlu1 %1451, %v307_v12  }
  0x4f   : > { %1452 = vset.pattern.permute.xlu1 %v1537_v0 }
  0x50   : > { %408 = vperm.xlu1 %1452, %v309_v14  }
  0x54   : > { %1453 = vset.pattern.permute.xlu1 %v1539_v7 }
  0x55   : > { %457 = vperm.xlu1 %1453, %v308_v13  }
  0x93   : > { %v381_v16 = vpop.permute.xlu1 %380  ;;  %v314_v17 = vpop.permute.xlu0 %313 }
  0x94   : > { %v355_v18 = vmul.f32 %v1672_v15, %v314_v17  ;;  %v415_v26 = vmul.f32 %v1683_v22, %v381_v16 }
  0x96   : > { %v370_v23 = vadd.f32 %v1678_v19, %v355_v18 }
  0x97   : > { %v385_v20 = vpop.permute.xlu1 %384  ;;  %v319_v21 = vpop.permute.xlu0 %318 }
  0x98   : > { %v356_v24 = vmul.f32 %v1672_v15, %v319_v21  ;;  %v423_v31 = vadd.f32 %v415_v26, %v370_v23  ;;  %v416_v32 = vmul.f32 %v1683_v22, %v385_v20 }
  0x9a   : > { %v371_v29 = vadd.f32 %v1678_v19, %v356_v24 }
  0x9b   : > { %v324_v27 = vpop.permute.xlu0 %323 }
  0x9c   : > { %v434_v28 = vpop.permute.xlu1 %433  ;;  %v424_v36 = vadd.f32 %v416_v32, %v371_v29  ;;  %v357_v41 = vmul.f32 %v1672_v15, %v324_v27 }
  0x9d   : > { %v468_v30 = vmul.f32 %v1690_v25, %v434_v28 }
  0x9e   : > { %v372_v44 = vadd.f32 %v1678_v19, %v357_v41 }
  0x9f   : > { %v476_v33 = vadd.f32 %v468_v30, %v423_v31  ;;  %v329_v34 = vpop.permute.xlu0 %328  ;;  %v1227_v30 = vld [vmem:[%s1852_s3 + $0x20] sm:$0xff] }
  0xa0   : > { %v438_v35 = vpop.permute.xlu1 %437  ;;  %v358_v45 = vmul.f32 %v1672_v15, %v329_v34  ;;  %v1218_v31 = vld [vmem:[%s1853_s4] ss:$0 sm:$0xff] }
  0xa1   : > { %v469_v37 = vmul.f32 %v1690_v25, %v438_v35  ;;  %1310 = vmatprep.mubr.msk.f32.mxu0 %vm495_vm0, %v476_v33 }
  0xa2   : > { %v373_v51 = vadd.f32 %v1678_v19, %v358_v45 }
  0xa3   : > { %v477_v38 = vadd.f32 %v469_v37, %v424_v36 }
  0xa4   : > { %v442_v39 = vpop.permute.xlu0 %441 }
  0xa5   : > { %v393_v40 = vpop.permute.xlu1 %392  ;;  %1311 = vmatmul.mubr.msk.f32.vlgmr.msra.gmra.mxu0 %vm495_vm0, %v477_v38  ;;  %v470_v47 = vmul.f32 %v1690_v25, %v442_v39 }
  0xa6   : > { %v418_v52 = vmul.f32 %v1683_v22, %v393_v40 }
  0xa8   : > { %v450_v42 = vpop.permute.xlu0 %449  ;;  %v426_v60 = vadd.f32 %v418_v52, %v373_v51 }
  0xa9   : > { %v472_v55 = vmul.f32 %v1690_v25, %v450_v42 }
  0xaa   : > { %v334_v43 = vpop.permute.xlu1 %333 }
  0xab   : > { %v359_v48 = vmul.f32 %v1672_v15, %v334_v43 }
  0xad   : > { %v389_v46 = vpop.permute.xlu0 %388  ;;  %v374_v56 = vadd.f32 %v1678_v19, %v359_v48 }
  0xae   : > { %v417_v49 = vmul.f32 %v1683_v22, %v389_v46  ;;  %v339_v50 = vpop.permute.xlu1 %338 }
  0xaf   : > { %v360_v3 = vmul.f32 %v1672_v15, %v339_v50 }
  0xb0   : > { %v425_v53 = vadd.f32 %v417_v49, %v372_v44 }
  0xb1   : > { %v397_v54 = vpop.permute.xlu0 %396  ;;  %v375_v6 = vadd.f32 %v1678_v19, %v360_v3 }
  0xb2   : > { %v478_v57 = vadd.f32 %v470_v47, %v425_v53  ;;  %v419_v58 = vmul.f32 %v1683_v22, %v397_v54 }
  0xb3   : > { %v446_v59 = vpop.permute.xlu1 %445 }
  0xb4   : > { %v427_v61 = vadd.f32 %v419_v58, %v374_v56  ;;  %v471_v62 = vmul.f32 %v1690_v25, %v446_v59  ;;  %1313 = vmatprep.mubr.msk.f32.mxu0 %vm495_vm0, %v478_v57  ;;  %v1244_v56 = vld [vmem:[%s1852_s3 + $0x58] sm:$0xff]  ;;  %v1243_v57 = vld [vmem:[%s1852_s3 + $0x50] sm:$0xff]  ;;  %v1242_v58 = vld [vmem:[%s1852_s3 + $0x48] sm:$0xff] }
  0xb5   : > { %v405_v11 = vpop.permute.xlu0 %404  ;;  %1342 = vmatprep.subr.mxu0 %v1244_v56  ;;  %v1241_v59 = vld [vmem:[%s1852_s3 + $0x40] sm:$0xff] }
  0xb6   : > { %v479_v63 = vadd.f32 %v471_v62, %v426_v60  ;;  %v480_v0 = vadd.f32 %v472_v55, %v427_v61  ;;  %v421_v18 = vmul.f32 %v1683_v22, %v405_v11  ;;  %1343 = vmatpush3.msra.mxu0 %v1244_v56  ;;  %v1232_v60 = vld [vmem:[%s1853_s4 + $0x1] ss:$0 sm:$0xff] }
  0xb7   : > { %1344 = vmatprep.subr.mxu0 %v1243_v57 }
  0xb8   : > { %v401_v1 = vpop.permute.xlu1 %400  ;;  %1314 = vmatmul.mubr.msk.f32.gmra.mxu0 %vm495_vm0, %v479_v63  ;;  %1316 = vmatprep.mubr.msk.f32.mxu1 %vm495_vm0, %v480_v0 }
  0xb9   : > { %v420_v5 = vmul.f32 %v1683_v22, %v401_v1  ;;  %1345 = vmatpush3.msra.mxu0 %v1243_v57 }
  0xba   : > { %v462_v20 = vpop.permute.xlu0 %461  ;;  %1346 = vmatprep.subr.mxu0 %v1242_v58 }
  0xbb   : > { %v428_v8 = vadd.f32 %v420_v5, %v375_v6  ;;  %v475_v24 = vmul.f32 %v1690_v25, %v462_v20  ;;  %1347 = vmatpush3.msra.mxu0 %v1242_v58 }
  0xbc   : > { %1348 = vmatprep.subr.mxu0 %v1241_v59 }
  0xbd   : > { %v344_v2 = vpop.permute.xlu1 %343  ;;  %1349 = vmatpush3.msra.mxu0 %v1241_v59 }
  0xbe   : > { %v361_v10 = vmul.f32 %v1672_v15, %v344_v2 }
  0xc0   : > { %v376_v17 = vadd.f32 %v1678_v19, %v361_v10 }
  0xc1   : > { %v349_v4 = vpop.permute.xlu1 %348 }
  0xc2   : > { %v362_v13 = vmul.f32 %v1672_v15, %v349_v4  ;;  %v429_v27 = vadd.f32 %v421_v18, %v376_v17 }
  0xc4   : > { %v377_v21 = vadd.f32 %v1678_v19, %v362_v13  ;;  %v1229_v19 = vld [vmem:[%s1852_s3 + $0x30] sm:$0xff] }
  0xc6   : > { %v454_v7 = vpop.permute.xlu1 %453 }
  0xc7   : > { %v473_v9 = vmul.f32 %v1690_v25, %v454_v7 }
  0xc9   : > { %v481_v12 = vadd.f32 %v473_v9, %v428_v8 }
  0xcb   : > { %v409_v14 = vpop.permute.xlu1 %408  ;;  %1317 = vmatmul.mubr.msk.f32.vlgmr.msra.gmra.mxu1 %vm495_vm0, %v481_v12 }
  0xcc   : > { %v422_v16 = vmul.f32 %v1683_v22, %v409_v14  ;;  %v1230_v22 = vld [vmem:[%s1852_s3 + $0x38] sm:$0xff] }
  0xcd   : > { %1322 = vmatprep.subr.mxu1 %v1230_v22 }
  0xce   : > { %v430_v23 = vadd.f32 %v422_v16, %v377_v21  ;;  %1323 = vmatpush3.msra.mxu1 %v1230_v22 }
  0xcf   : > { %1324 = vmatprep.subr.mxu1 %v1229_v19 }
  0xd0   : > { %v458_v26 = vpop.permute.xlu1 %457  ;;  %v483_v29 = vadd.f32 %v475_v24, %v430_v23  ;;  %1325 = vmatpush3.msra.mxu1 %v1229_v19  ;;  %v1540_v24 = vmov 0.0  }
  0xd1   : > { %v474_v28 = vmul.f32 %v1690_v25, %v458_v26  ;;  %v1228_v25 = vld [vmem:[%s1852_s3 + $0x28] sm:$0xff]  ;;  %993 = vst.msk [vmem:[#allocation2] sm:$0xff] %vm495_vm0, %v1540_v24  ;;  %v1028_v26 = vld [vmem:[%s1854_s5 + $0x18] sm:$0xff] }
  0xd2   : > { %1326 = vmatprep.subr.mxu1 %v1228_v25 }
  0xd3   : > { %v482_v15 = vadd.f32 %v474_v28, %v429_v27  ;;  %1327 = vmatpush3.msra.mxu1 %v1228_v25  ;;  %v1027_v27 = vld [vmem:[%s1854_s5 + $0x10] sm:$0xff]  ;;  %v1026_v28 = vld [vmem:[%s1854_s5 + $0x8] sm:$0xff]  ;;  %v1246_v25 = vld [vmem:[%s1853_s4 + $0x2] ss:$0 sm:$0xff] }
  0xd4   : > { %1328 = vmatprep.subr.mxu1 %v1227_v30 }
  0xd5   : > { %1319 = vmatprep.mubr.msk.f32.mxu1 %vm495_vm0, %v482_v15  ;;  %1329 = vmatpush3.msra.mxu1 %v1227_v30  ;;  %v1025_v15 = vld [vmem:[%s1854_s5] sm:$0xff] }
  0xd6   : > { %1320 = vmatmul.mubr.msk.f32.gmra.mxu1 %vm495_vm0, %v483_v29  ;;  %1362 = vmatprep.subr.mxu1 %v1540_v24 }
 0x165   : > { %v1312_v32 = vpop.f32.mrf.mxu0 }
 0x166   : > { %v592_v33 = vadd.f32 %v1312_v32, %v1218_v31 }
 0x167   : > { %v586_v34 = vpop.f32.mrf.mxu0 }
 0x168   : > { %v587_v35 = vadd.f32 %v1218_v31, %v586_v34  ;;  %v626_v37 = vmax.f32 %v592_v33, 0.0 }
 0x16a   : > { %v625_v36 = vmax.f32 %v587_v35, 0.0 }
 0x16c   : > { %1330 = vmatprep.mubr.msk.f32.mxu1 %vm495_vm0, %v625_v36 }
 0x16d   : > { %1331 = vmatmul.mubr.msk.f32.vlgmr.msra.gmra.mxu1 %vm495_vm0, %v626_v37 }
 0x16e   : > { %1363 = vmatpush3.msra.mxu1 %v1028_v26 }
 0x16f   : > { %1364 = vmatprep.subr.mxu1 %v1540_v24 }
 0x170   : > { %1365 = vmatpush3.msra.mxu1 %v1027_v27 }
 0x171   : > { %1366 = vmatprep.subr.mxu1 %v1540_v24 }
 0x172   : > { %1367 = vmatpush3.msra.mxu1 %v1026_v28 }
 0x173   : > { %1368 = vmatprep.subr.mxu1 %v1540_v24 }
 0x174   : > { %1369 = vmatpush3.msra.mxu1 %v1025_v15 }
 0x178   : > { %v1315_v38 = vpop.f32.mrf.mxu0 }
 0x179   : > { %v602_v39 = vadd.f32 %v1315_v38, %v1218_v31 }
 0x17a   : > { %v596_v40 = vpop.f32.mrf.mxu0 }
 0x17b   : > { %v597_v41 = vadd.f32 %v1218_v31, %v596_v40  ;;  %v628_v43 = vmax.f32 %v602_v39, 0.0 }
 0x17d   : > { %v627_v42 = vmax.f32 %v597_v41, 0.0 }
 0x17f   : > { %1333 = vmatprep.mubr.msk.f32.mxu1 %vm495_vm0, %v627_v42 }
 0x180   : > { %1334 = vmatmul.mubr.msk.f32.gmra.mxu1 %vm495_vm0, %v628_v43 }
 0x18b   : > { %v1318_v44 = vpop.f32.mrf.mxu1 }
 0x18c   : > { %v612_v45 = vadd.f32 %v1318_v44, %v1218_v31 }
 0x18d   : > { %v606_v46 = vpop.f32.mrf.mxu1 }
 0x18e   : > { %v607_v47 = vadd.f32 %v1218_v31, %v606_v46  ;;  %v630_v49 = vmax.f32 %v612_v45, 0.0 }
 0x190   : > { %v629_v48 = vmax.f32 %v607_v47, 0.0 }
 0x192   : > { %1336 = vmatprep.mubr.msk.f32.mxu1 %vm495_vm0, %v629_v48 }
 0x193   : > { %1337 = vmatmul.mubr.msk.f32.gmra.mxu1 %vm495_vm0, %v630_v49 }
 0x196   : > { %v1321_v50 = vpop.f32.mrf.mxu1 }
 0x197   : > { %v622_v51 = vadd.f32 %v1321_v50, %v1218_v31 }
 0x198   : > { %v616_v52 = vpop.f32.mrf.mxu1 }
 0x199   : > { %v617_v53 = vadd.f32 %v1218_v31, %v616_v52  ;;  %v632_v55 = vmax.f32 %v622_v51, 0.0 }
 0x19b   : > { %v631_v54 = vmax.f32 %v617_v53, 0.0 }
 0x19d   : > { %1339 = vmatprep.mubr.msk.f32.mxu1 %vm495_vm0, %v631_v54 }
 0x19e   : > { %1340 = vmatmul.mubr.msk.f32.gmra.mxu1 %vm495_vm0, %v632_v55 }
 0x19f   : > { %1370 = vmatprep.mubr.msk.f32.mxu1 %vm1541_vm1, %v1540_v24 }
 0x22d   : > { %v1332_v61 = vpop.f32.mrf.mxu1 }
 0x22e   : > { %v742_v62 = vadd.f32 %v1332_v61, %v1232_v60 }
 0x22f   : > { %v736_v63 = vpop.f32.mrf.mxu1 }
 0x230   : > { %v737_v0 = vadd.f32 %v1232_v60, %v736_v63  ;;  %v776_v2 = vmax.f32 %v742_v62, 0.0 }
 0x232   : > { %v775_v1 = vmax.f32 %v737_v0, 0.0 }
 0x234   : > { %1350 = vmatprep.mubr.msk.f32.mxu0 %vm495_vm0, %v775_v1 }
 0x235   : > { %1351 = vmatmul.mubr.msk.f32.vlgmr.msra.gmra.mxu0 %vm495_vm0, %v776_v2 }
 0x240   : > { %v1335_v3 = vpop.f32.mrf.mxu1 }
 0x241   : > { %v752_v4 = vadd.f32 %v1335_v3, %v1232_v60 }
 0x242   : > { %v746_v5 = vpop.f32.mrf.mxu1 }
 0x243   : > { %v747_v6 = vadd.f32 %v1232_v60, %v746_v5  ;;  %v778_v8 = vmax.f32 %v752_v4, 0.0 }
 0x245   : > { %v777_v7 = vmax.f32 %v747_v6, 0.0 }
 0x247   : > { %1353 = vmatprep.mubr.msk.f32.mxu0 %vm495_vm0, %v777_v7 }
 0x248   : > { %1354 = vmatmul.mubr.msk.f32.gmra.mxu0 %vm495_vm0, %v778_v8 }
 0x253   : > { %v1338_v9 = vpop.f32.mrf.mxu1 }
 0x254   : > { %v762_v10 = vadd.f32 %v1338_v9, %v1232_v60 }
 0x255   : > { %v756_v11 = vpop.f32.mrf.mxu1 }
 0x256   : > { %v757_v12 = vadd.f32 %v1232_v60, %v756_v11  ;;  %v780_v14 = vmax.f32 %v762_v10, 0.0 }
 0x258   : > { %v779_v13 = vmax.f32 %v757_v12, 0.0 }
 0x25a   : > { %1356 = vmatprep.mubr.msk.f32.mxu0 %vm495_vm0, %v779_v13 }
 0x25b   : > { %1357 = vmatmul.mubr.msk.f32.gmra.mxu0 %vm495_vm0, %v780_v14 }
 0x25e   : > { %v1341_v16 = vpop.f32.mrf.mxu1 }
 0x25f   : > { %v772_v17 = vadd.f32 %v1341_v16, %v1232_v60 }
 0x260   : > { %v766_v18 = vpop.f32.mrf.mxu1 }
 0x261   : > { %v767_v20 = vadd.f32 %v1232_v60, %v766_v18  ;;  %v782_v23 = vmax.f32 %v772_v17, 0.0 }
 0x263   : > { %v781_v21 = vmax.f32 %v767_v20, 0.0 }
 0x265   : > { %1359 = vmatprep.mubr.msk.f32.mxu0 %vm495_vm0, %v781_v21 }
 0x266   : > { %1360 = vmatmul.mubr.msk.f32.gmra.mxu0 %vm495_vm0, %v782_v23 }
 0x2f5   : > { %v1352_v29 = vpop.f32.mrf.mxu0 }
 0x2f6   : > { %v892_v32 = vadd.f32 %v1352_v29, %v1246_v25 }
 0x2f7   : > { %v886_v22 = vpop.f32.mrf.mxu0 }
 0x2f8   : > { %v887_v31 = vadd.f32 %v1246_v25, %v886_v22  ;;  %v926_v35 = vmax.f32 %v892_v32, 0.0 }
 0x2fa   : > { %v925_v34 = vmax.f32 %v887_v31, 0.0  ;;  %v940_v39 = vsel %vm495_vm0, %v926_v35, 0.0 }
 0x2fb   : > { %v941_v43 = vrot.slane %v940_v39, 4 }
 0x2fc   : > { %v933_v38 = vsel %vm495_vm0, %v925_v34, 0.0 }
 0x2fd   : > { %v934_v42 = vrot.slane %v933_v38, 4  ;;  %v942_v50 = vadd.f32 %v941_v43, %v940_v39 }
 0x2ff   : > { %v935_v48 = vadd.f32 %v934_v42, %v933_v38  ;;  %v943_v58 = vrot.slane %v942_v50, 2 }
 0x301   : > { %v936_v57 = vrot.slane %v935_v48, 2  ;;  %v944_v2 = vadd.f32 %v943_v58, %v942_v50 }
 0x303   : > { %v937_v0 = vadd.f32 %v936_v57, %v935_v48  ;;  %v945_v13 = vrot.slane %v944_v2, 1  ;;  %v994_v48 = vld [vmem:[#allocation2] sm:$0xff] }
 0x305   : > { %v938_v10 = vrot.slane %v937_v0, 1  ;;  %v946_v22 = vadd.f32 %v945_v13, %v944_v2 }
 0x307   : > { %v939_v24 = vadd.f32 %v938_v10, %v937_v0 }
 0x308   : > { %v1355_v19 = vpop.f32.mrf.mxu0 }
 0x309   : > { %v902_v37 = vadd.f32 %v1355_v19, %v1246_v25  ;;  %v1004_v32 = vsel %vm1003_vm2, %v946_v22, %v939_v24 }
 0x30a   : > { %v896_v30 = vpop.f32.mrf.mxu0 }
 0x30b   : > { %v897_v33 = vadd.f32 %v1246_v25, %v896_v30  ;;  %v928_v41 = vmax.f32 %v902_v37, 0.0 }
 0x30d   : > { %v927_v36 = vmax.f32 %v897_v33, 0.0  ;;  %v954_v46 = vsel %vm495_vm0, %v928_v41, 0.0 }
 0x30e   : > { %v955_v54 = vrot.slane %v954_v46, 4 }
 0x30f   : > { %v947_v40 = vsel %vm495_vm0, %v927_v36, 0.0 }
 0x310   : > { %v948_v44 = vrot.slane %v947_v40, 4  ;;  %v956_v61 = vadd.f32 %v955_v54, %v954_v46  ;;  %v1255_v54 = vld [vmem:[%s1855_s6] ss:$0 sm:$0xff] }
 0x312   : > { %v949_v51 = vadd.f32 %v948_v44, %v947_v40  ;;  %v957_v5 = vrot.slane %v956_v61, 2 }
 0x314   : > { %v950_v59 = vrot.slane %v949_v51, 2  ;;  %v958_v17 = vadd.f32 %v957_v5, %v956_v61 }
 0x316   : > { %v951_v3 = vadd.f32 %v950_v59, %v949_v51  ;;  %v959_v19 = vrot.slane %v958_v17, 1 }
 0x318   : > { %v952_v14 = vrot.slane %v951_v3, 1  ;;  %v960_v37 = vadd.f32 %v959_v19, %v958_v17 }
 0x31a   : > { %v953_v27 = vadd.f32 %v952_v14, %v951_v3 }
 0x31b   : > { %v1358_v45 = vpop.f32.mrf.mxu0 }
 0x31c   : > { %v912_v47 = vadd.f32 %v1358_v45, %v1246_v25  ;;  %v1006_v33 = vsel %vm1005_vm3, %v953_v27, %v1004_v32 }
 0x31d   : > { %v906_v49 = vpop.f32.mrf.mxu0  ;;  %v1008_v40 = vsel %vm1007_vm4, %v960_v37, %v1006_v33 }
 0x31e   : > { %v930_v52 = vmax.f32 %v912_v47, 0.0  ;;  %v907_v53 = vadd.f32 %v1246_v25, %v906_v49 }
 0x320   : > { %v968_v55 = vsel %vm495_vm0, %v930_v52, 0.0  ;;  %v929_v56 = vmax.f32 %v907_v53, 0.0 }
 0x321   : > { %v969_v62 = vrot.slane %v968_v55, 4 }
 0x322   : > { %v961_v60 = vsel %vm495_vm0, %v929_v56, 0.0 }
 0x323   : > { %v962_v63 = vrot.slane %v961_v60, 4  ;;  %v970_v6 = vadd.f32 %v969_v62, %v968_v55  ;;  %v1109_v62 = vlaneseq }
 0x325   : > { %v963_v1 = vadd.f32 %v962_v63, %v961_v60  ;;  %v971_v18 = vrot.slane %v970_v6, 2  ;;  %v1110_v63 = vand.u32 127, %v1109_v62 }
 0x326   : > { %v1361_v4 = vpop.f32.mrf.mxu0 }
 0x327   : > { %v964_v7 = vrot.slane %v963_v1, 2  ;;  %v922_v8 = vadd.f32 %v1361_v4, %v1246_v25  ;;  %vm1118_vm9 = vcmp.lt.s32.totalorder %v1110_v63, 32 }
 0x328   : > { %v916_v9 = vpop.f32.mrf.mxu0 }
 0x329   : > { %v932_v11 = vmax.f32 %v922_v8, 0.0  ;;  %v917_v12 = vadd.f32 %v1246_v25, %v916_v9  ;;  %v965_v16 = vadd.f32 %v964_v7, %v963_v1  ;;  %v972_v25 = vadd.f32 %v971_v18, %v970_v6 }
 0x32b   : > { %v982_v20 = vsel %vm495_vm0, %v932_v11, 0.0  ;;  %v931_v21 = vmax.f32 %v917_v12, 0.0  ;;  %v966_v28 = vrot.slane %v965_v16, 1  ;;  %v973_v38 = vrot.slane %v972_v25, 1 }
 0x32c   : > { %v983_v23 = vrot.slane %v982_v20, 4 }
 0x32d   : > { %v975_v26 = vsel %vm495_vm0, %v931_v21, 0.0  ;;  %v967_v34 = vadd.f32 %v966_v28, %v965_v16  ;;  %v974_v44 = vadd.f32 %v973_v38, %v972_v25 }
 0x32e   : > { %v984_v15 = vadd.f32 %v983_v23, %v982_v20  ;;  %v976_v29 = vrot.slane %v975_v26, 4 }
 0x32f   : > { %v1010_v42 = vsel %vm1009_vm5, %v967_v34, %v1008_v40 }
 0x330   : > { %v985_v30 = vrot.slane %v984_v15, 2  ;;  %v977_v31 = vadd.f32 %v976_v29, %v975_v26  ;;  %v1012_v47 = vsel %vm1011_vm6, %v974_v44, %v1010_v42 }
 0x332   : > { %v986_v35 = vadd.f32 %v985_v30, %v984_v15  ;;  %v978_v36 = vrot.slane %v977_v31, 2 }
 0x334   : > { %v979_v39 = vadd.f32 %v978_v36, %v977_v31  ;;  %v987_v41 = vrot.slane %v986_v35, 1 }
 0x336   : > { %v980_v43 = vrot.slane %v979_v39, 1  ;;  %v988_v46 = vadd.f32 %v987_v41, %v986_v35 }
 0x338   : > { %v981_v45 = vadd.f32 %v980_v43, %v979_v39 }
 0x33a   : > { %v1014_v49 = vsel %vm1013_vm7, %v981_v45, %v1012_v47 }
 0x33b   : > { %v1016_v50 = vsel %vm1015_vm8, %v988_v46, %v1014_v49 }
 0x33c   : > { %v1018_v51 = vadd.f32 %v1016_v50, %v994_v48 }
 0x33e   : > { %1019 = vst.msk [vmem:[#allocation2] sm:$0xff] %vm495_vm0, %v1018_v51 }
 0x345   : > { %v1023_v52 = vld [vmem:[#allocation2] sm:$0xff] }
 0x346   : > { %v1024_v53 = vmul.f32 0.125, %v1023_v52 }
 0x348   : > { %1371 = vmatmul.mubr.msk.f32.vlgmr.msra.gmra.mxu1 %vm495_vm0, %v1024_v53 }
 0x408   : > { %v1105_v55 = vpop.f32.mrf.mxu1 }
 0x409   : > { %v1106_v56 = vadd.f32 %v1255_v54, %v1105_v55 }
 0x40a   : > { %v1372_v57 = vpop.f32.mrf.mxu1 }
 0x40b   : > { %v1111_v58 = vsub.f32 0.0, %v1106_v56 }
 0x40d   : > { %v1112_v59 = vmul.f32 1.442695, %v1111_v58 }
 0x40f   : > { %1455 = vpow2.f32 %v1112_v59 }
 0x41c   : > { %v1456_v60 = vpop.eup %1455 }
 0x41d   : > { %v1114_v61 = vadd.f32 1.0, %v1456_v60 }
 0x41f   : > { %1457 = vrcp.f32 %v1114_v61 }
 0x42c   : > { %v1458_v0 = vpop.eup %1457 }
 0x42d   : > { %v1116_v1 = vmul.f32 0.9, %v1458_v0 }
 0x42f   : > { %v1117_v2 = vadd.f32 0.1, %v1116_v1 }
 0x431   : > { %v1119_v3 = vsel %vm1118_vm9, %v1106_v56, %v1117_v2 }
 0x432   : > { %1121 = vst.msk [vmem:[%s292_s19] sm:$0xff] %vm1120_vm10, %v1119_v3 }
 0x433   : > { %1472 = shalt.err (!%p1469_p5)
}
 0x434   : > { %s1473_s15 = scalar_lea.hbm %s1809_s23, 128  ;;  %s1477_s18 = scalar_lea.hbm %s1856_s7, 512 }
 0x435   : > { %p1474_p6 = scmp.ne.s32.totalorder %s1809_s23, %s1473_s15  ;;  %p1478_p10 = scmp.lt.s32.totalorder %s1809_s23, %s1856_s7 }
 0x436   : > { %p1479_p11 = scmp.lt.s32.totalorder %s1477_s18, %s1473_s15 }
 0x437   : > { %p1475_p7 = pnand %p1474_p6, %p1623_p4 }
 0x438   : > { %p1480_p12 = por %p1479_p11, %p1478_p10 }
 0x439   : > { %p1476_p9 = pneg %p1475_p7 }
 0x43b   : > { %p1481_p13 = pnand %p1480_p12, %p1476_p9 }
 0x43d   : > { %1484 = shalt.err (!%p1481_p13)
}
 0x43e   : > { %1381 = dma.vmem_to_hbm [thread:$0]  (%p1623_p4), %s1137_s20, 128, %s1809_s23, %s1123_s30  }
 0x43f PF: > { %p1387_p0 = scmp.ge.s32.totalorder %s1535_s29, 2  ;;  %s1148_s22 = sand.u32 1, %s1515_s24  }
 0x440   : > { %s1149_s8 = scalar_lea.sflag [#allocation4], %s1148_s22 }
 0x441   : > { %p1384_p1 = pnand %p1387_p0, %p1630_p8 }
 0x443   : > { %p1385_p2 = pneg %p1384_p1 }
 0x445   : > { %1510 = dma.done.wait (%p1385_p2), %s1149_s8, 128  }
 0x446   : > { %1512 = vsyncadd (%p1385_p2), %s1149_s8, 4294967168  ;;  %s20_s29 = sadd.s32 1, %s1535_s29   ;;  %s1859_s24 = smov %s1519_s25 }
 0x447   : > { %p17_p3 = scmp.ge.s32.totalorder %s20_s29, 6   ;;  %s1860_s25 = smov %s1523_s26 }
 0x448   : > { %s1861_s26 = smov %s1636_s14  ;;  %s1862_s27 = smov %s1531_s28 }
 0x449   : > { %s1863_s28 = smov %s1865_s9  ;;  %19 = sbr.rel (!%p17_p3) target bundleno = 4 (0x4), region = 95 }
 0x44e   :  { %1154 = vsyncpa [#allocation4], 1 }
 0x44f   :  { %1156 = vsyncpa [#allocation4 + $0x1], 1 }

</bundles_post_ra>
